<compile_context>
chip_gen: v6e
topology: v6e:2x2x1
jax: 0.10.0
libtpu: 0.0.40
codegen_flags: <defaults>
</compile_context>

<pallas_src>
import jax
import jax.numpy as jnp
import numpy as np
from jax.experimental import pallas as pl
from jax.experimental.pallas import tpu as pltpu

# ---- model hyperparameters (small, consistent with the module) ----
B = 2            # batch
T = 8            # tokens (seq)
E = 32           # embedding_dim
H = 4            # num_heads
HD = E // H      # num_headsize
BT = B * T
RESIDUAL = 0.0   # module default residual=False
LN_EPS = 1e-5
SCALE = float(E) ** (-0.25)   # queries & keys each divided by embedding_dim**0.25
NEG_INF = -1e30


def _build_const_table():
    """Static lookup tensors, packed into one lane-dense (192, 64) f32 slab."""
    # per-head averaging matrix over contiguous HD-lane groups, for [q | k] lanes
    g = np.arange(2 * E) // HD
    avg = (g[:, None] == g[None, :]).astype(np.float32) / HD                 # (2E, 2E)
    # head-lane mask: row h*BT+t keeps only head h's HD lanes
    head_row = np.repeat(np.arange(H), BT)
    head_lane = np.arange(E) // HD
    emask = (head_row[:, None] == head_lane[None, :]).astype(np.float32)     # (H*BT, E)
    # block-of-ones: per-head (BT-wide) segment sums, broadcast back to each lane
    seg = np.arange(H * BT) // BT
    ones_bd = (seg[:, None] == seg[None, :]).astype(np.float32)              # (H*BT, H*BT)

    tbl = np.zeros((2 * E + 2 * H * BT, 2 * E), np.float32)                  # (192, 64)
    tbl[0:2 * E, 0:2 * E] = avg
    tbl[2 * E:2 * E + H * BT, 0:E] = emask
    tbl[2 * E + H * BT:, 0:H * BT] = ones_bd
    return tbl


_CONST_TBL = _build_const_table()


def attention_kernel(x_ref, w_ref, bv_ref, tbl_ref, o_ref):
    x = x_ref[...]                                                  # (BT, E)

    # ---- fused QKV projection: one MXU op on the packed weight slab ----
    qkv = jnp.dot(x, w_ref[:, :3 * E], preferred_element_type=jnp.float32)   # (BT, 3E)
    qk = qkv[:, :2 * E]                                             # (BT, 2E) = [q | k]
    v = qkv[:, 2 * E:]                                              # (BT, E)

    # ---- per-head LayerNorm (kqnorm): two INDEPENDENT averaging matmuls ----
    # var = E[x^2] - mean^2 so the second matmul does not wait on the first.
    avg = tbl_ref[0:2 * E, :]                                       # (2E, 2E) const
    mean = jnp.dot(qk, avg, preferred_element_type=jnp.float32)     # (BT, 2E)
    ex2 = jnp.dot(qk * qk, avg, preferred_element_type=jnp.float32)
    var = ex2 - mean * mean
    gamma = bv_ref[BT:BT + 1, :]                                    # (1, 2E) LN weight * SCALE
    beta = bv_ref[BT + 1:BT + 2, :]                                 # (1, 2E) LN bias   * SCALE
    qk_n = (qk - mean) * jax.lax.rsqrt(var + LN_EPS) * gamma + beta
    q_s = qk_n[:, :E]                                               # (BT, E) normed+scaled q
    k_s = qk_n[:, E:]                                               # (BT, E) normed+scaled k

    # ---- block-diagonal all-heads layout: (H*BT, E) K/V with head-lane mask ----
    emask = tbl_ref[2 * E:2 * E + H * BT, 0:E]                      # (H*BT, E) const
    k_bd = jnp.concatenate([k_s] * H, axis=0) * emask               # (H*BT, E)
    v_bd = jnp.concatenate([v] * H, axis=0) * emask                 # (H*BT, E)

    # scores for all heads at once: (BT, H*BT); contraction over masked lanes
    s = jax.lax.dot_general(q_s, k_bd, (((1,), (1,)), ((), ())),
                            preferred_element_type=jnp.float32)

    # ---- softmax (per head segment), mask folded in as an additive bias ----
    # no max-subtraction: LN + embedding_dim**-0.25 scaling bounds |s| <= ~10,
    # masked entries are -1e30 -> exp underflows to 0.
    p = jnp.exp(s + bv_ref[0:BT, :])                                # (BT, H*BT)
    seg = tbl_ref[2 * E + H * BT:, 0:H * BT]                        # (H*BT, H*BT) block-of-ones
    denom = jnp.dot(p, seg, preferred_element_type=jnp.float32)     # per-head sums, per lane
    inv = pl.reciprocal(denom, approx=True)                         # EUP estimate
    inv = inv * (2.0 - denom * inv)                                 # one Newton step -> ~f32
    p = p * inv

    # ---- attention * values: heads land directly in their lane slots ----
    att = jnp.dot(p, v_bd, preferred_element_type=jnp.float32)      # (BT, E)

    # ---- unify heads (+ bias) ----
    out = jnp.dot(att, w_ref[:, 3 * E:], preferred_element_type=jnp.float32) \
        + bv_ref[BT + 2:BT + 3, 0:E]
    if RESIDUAL != 0.0:                                             # residual=False -> dropped at trace
        out = out + x * RESIDUAL
    o_ref[...] = out


def attention_forward(x, mask, params):
    """x: (B, T, E); mask: (B, T) of {0,1} floats; params in (in, out) layout."""
    wq, wk, wv, wu, bu, qw, qb, kw, kb = params

    # ---- host-side packing (layout plumbing, done once outside the kernel) ----
    w_all = jnp.concatenate([wq, wk, wv, wu], axis=1)                               # (E, 4E)
    gamma = jnp.concatenate([jnp.tile(qw, (1, H)), jnp.tile(kw, (1, H))], axis=1) * SCALE
    beta = jnp.concatenate([jnp.tile(qb, (1, H)), jnp.tile(kb, (1, H))], axis=1) * SCALE
    bu_row = jnp.concatenate([bu, jnp.zeros((1, E), jnp.float32)], axis=1)          # (1, 2E)

    # additive attention bias: same-batch block structure x token validity, tiled per head
    m = mask.reshape(BT)
    bidx = np.arange(BT) // T
    same_batch = jnp.asarray(bidx[:, None] == bidx[None, :])
    valid = same_batch & ((m[:, None] * m[None, :]) > 0)
    bias = jnp.tile(jnp.where(valid, 0.0, NEG_INF).astype(jnp.float32), (1, H))     # (BT, H*BT)

    bv = jnp.concatenate([bias, gamma, beta, bu_row], axis=0)                       # (BT+3, 2E)
    x2 = x.reshape(BT, E)

    vmem = pl.BlockSpec(memory_space=pltpu.MemorySpace.VMEM)
    out = pl.pallas_call(
        attention_kernel,
        out_shape=jax.ShapeDtypeStruct((BT, E), jnp.float32),
        in_specs=[vmem] * 4,
        out_specs=pl.BlockSpec(memory_space=pltpu.MemorySpace.VMEM),
    )(x2, w_all, bv, jnp.asarray(_CONST_TBL))
    return out.reshape(B, T, E)


def reference_forward(x, mask, params):
    """Pure-JAX replica of the PyTorch forward for validation."""
    wq, wk, wv, wu, bu, qw, qb, kw, kb = params
    q = x @ wq
    k = x @ wk
    v = x @ wv
    q = q.reshape(B, T, H, HD)
    k = k.reshape(B, T, H, HD)
    v = v.reshape(B, T, H, HD)

    def ln(t, w, b):
        mu = t.mean(-1, keepdims=True)
        var = ((t - mu) ** 2).mean(-1, keepdims=True)
        return (t - mu) / jnp.sqrt(var + LN_EPS) * w + b

    q = ln(q, qw[0], qb[0])
    k = ln(k, kw[0], kb[0])
    q = jnp.transpose(q, (0, 2, 1, 3)) * SCALE          # (B,H,T,HD)
    k = jnp.transpose(k, (0, 2, 1, 3)) * SCALE
    v = jnp.transpose(v, (0, 2, 1, 3))
    scores = jnp.einsum('bhqd,bhkd->bhqk', q, k)
    amask = mask[:, None, :, None] * mask[:, None, None, :]
    scores = jnp.where(amask > 0, scores, -1e30)
    p = jax.nn.softmax(scores, axis=-1)
    out = jnp.einsum('bhqk,bhkd->bhqd', p, v)
    out = jnp.transpose(out, (0, 2, 1, 3)).reshape(B, T, E)
    out = out @ wu + bu[0]
    return out + x * RESIDUAL


if __name__ == "__main__":
    key = jax.random.PRNGKey(0)
    kx, k1, k2, k3, k4, k5 = jax.random.split(key, 6)

    x = jax.random.normal(kx, (B, T, E), dtype=jnp.float32)
    mask = jnp.ones((B, T), dtype=jnp.float32)   # forward(x, mask=None) -> all tokens valid

    # Deterministic parameter init (nn.Linear-style uniform; LayerNorm default w=1, b=0).
    bound = 1.0 / np.sqrt(E)
    wq = jax.random.uniform(k1, (E, E), jnp.float32, -bound, bound)   # already (in, out)
    wk = jax.random.uniform(k2, (E, E), jnp.float32, -bound, bound)
    wv = jax.random.uniform(k3, (E, E), jnp.float32, -bound, bound)
    wu = jax.random.uniform(k4, (E, E), jnp.float32, -bound, bound)
    bu = jax.random.uniform(k5, (1, E), jnp.float32, -bound, bound)
    qw = jnp.ones((1, HD), jnp.float32)
    qb = jnp.zeros((1, HD), jnp.float32)
    kw = jnp.ones((1, HD), jnp.float32)
    kb = jnp.zeros((1, HD), jnp.float32)
    params = (wq, wk, wv, wu, bu, qw, qb, kw, kb)

    out = attention_forward(x, mask, params)
    out = jax.block_until_ready(out)

    ref = reference_forward(x, mask, params)
    np.testing.assert_allclose(np.asarray(out), np.asarray(ref), rtol=1e-3, atol=1e-3)

    print("KERNEL_OK")
</pallas_src>

<mosaic_0001>
module attributes {stable_mosaic.version = 11 : i64} {
  func.func @attention_kernel(%arg0: memref<16x32xf32, #tpu.memory_space<vmem>>, %arg1: memref<32x128xf32, #tpu.memory_space<vmem>>, %arg2: memref<19x64xf32, #tpu.memory_space<vmem>>, %arg3: memref<192x64xf32, #tpu.memory_space<vmem>>, %arg4: memref<16x32xf32, #tpu.memory_space<vmem>>) attributes {dimension_semantics = [], scalar_prefetch = 0 : i64, scratch_operands = 0 : i64, tpu.core_type = #tpu.core_type<tc>} {
    %c0 = arith.constant 0 : index
    %c0_0 = arith.constant 0 : index
    %0 = vector.load %arg0[%c0, %c0_0] : memref<16x32xf32, #tpu.memory_space<vmem>>, vector<16x32xf32>
    %c0_1 = arith.constant 0 : index
    %c0_2 = arith.constant 0 : index
    %1 = vector.load %arg1[%c0_1, %c0_2] : memref<32x128xf32, #tpu.memory_space<vmem>>, vector<32x96xf32>
    %cst = arith.constant dense<0.000000e+00> : vector<16x96xf32>
    %2 = tpu.matmul %0, %1, %cst {dimension_numbers = #tpu.dot_dimension_numbers<[1], [0], [0], [1], [0, 0, 1, 1], [], []>} : vector<16x32xf32>, vector<32x96xf32>, vector<16x96xf32> -> vector<16x96xf32>
    %3 = vector.extract_strided_slice %2 {offsets = [0, 0], sizes = [16, 64], strides = [1, 1]} : vector<16x96xf32> to vector<16x64xf32>
    %4 = vector.extract_strided_slice %2 {offsets = [0, 64], sizes = [16, 32], strides = [1, 1]} : vector<16x96xf32> to vector<16x32xf32>
    %c0_3 = arith.constant 0 : index
    %c0_4 = arith.constant 0 : index
    %5 = vector.load %arg3[%c0_3, %c0_4] : memref<192x64xf32, #tpu.memory_space<vmem>>, vector<64x64xf32>
    %cst_5 = arith.constant dense<0.000000e+00> : vector<16x64xf32>
    %6 = tpu.matmul %3, %5, %cst_5 {dimension_numbers = #tpu.dot_dimension_numbers<[1], [0], [0], [1], [0, 0, 1, 1], [], []>} : vector<16x64xf32>, vector<64x64xf32>, vector<16x64xf32> -> vector<16x64xf32>
    %7 = arith.mulf %3, %3 : vector<16x64xf32>
    %cst_6 = arith.constant dense<0.000000e+00> : vector<16x64xf32>
    %8 = tpu.matmul %7, %5, %cst_6 {dimension_numbers = #tpu.dot_dimension_numbers<[1], [0], [0], [1], [0, 0, 1, 1], [], []>} : vector<16x64xf32>, vector<64x64xf32>, vector<16x64xf32> -> vector<16x64xf32>
    %9 = arith.mulf %6, %6 : vector<16x64xf32>
    %10 = arith.subf %8, %9 : vector<16x64xf32>
    %c16 = arith.constant 16 : index
    %c0_7 = arith.constant 0 : index
    %11 = vector.load %arg2[%c16, %c0_7] : memref<19x64xf32, #tpu.memory_space<vmem>>, vector<1x64xf32>
    %c17 = arith.constant 17 : index
    %c0_8 = arith.constant 0 : index
    %12 = vector.load %arg2[%c17, %c0_8] : memref<19x64xf32, #tpu.memory_space<vmem>>, vector<1x64xf32>
    %13 = arith.subf %3, %6 : vector<16x64xf32>
    %cst_9 = arith.constant 9.99999974E-6 : f32
    %14 = vector.broadcast %cst_9 : f32 to vector<16x64xf32>
    %15 = arith.addf %10, %14 : vector<16x64xf32>
    %16 = math.rsqrt %15 : vector<16x64xf32>
    %17 = arith.mulf %13, %16 : vector<16x64xf32>
    %18 = vector.broadcast %11 : vector<1x64xf32> to vector<16x64xf32>
    %19 = arith.mulf %17, %18 : vector<16x64xf32>
    %20 = vector.broadcast %12 : vector<1x64xf32> to vector<16x64xf32>
    %21 = arith.addf %19, %20 : vector<16x64xf32>
    %22 = vector.extract_strided_slice %21 {offsets = [0, 0], sizes = [16, 32], strides = [1, 1]} : vector<16x64xf32> to vector<16x32xf32>
    %23 = vector.extract_strided_slice %21 {offsets = [0, 32], sizes = [16, 32], strides = [1, 1]} : vector<16x64xf32> to vector<16x32xf32>
    %c64 = arith.constant 64 : index
    %c0_10 = arith.constant 0 : index
    %24 = vector.load %arg3[%c64, %c0_10] : memref<192x64xf32, #tpu.memory_space<vmem>>, vector<64x32xf32>
    %25 = tpu.concatenate %23, %23, %23, %23 in 0 : vector<16x32xf32>, vector<16x32xf32>, vector<16x32xf32>, vector<16x32xf32> -> vector<64x32xf32>
    %26 = arith.mulf %25, %24 : vector<64x32xf32>
    %27 = tpu.concatenate %4, %4, %4, %4 in 0 : vector<16x32xf32>, vector<16x32xf32>, vector<16x32xf32>, vector<16x32xf32> -> vector<64x32xf32>
    %28 = arith.mulf %27, %24 : vector<64x32xf32>
    %cst_11 = arith.constant dense<0.000000e+00> : vector<16x64xf32>
    %29 = tpu.matmul %22, %26, %cst_11 {dimension_numbers = #tpu.dot_dimension_numbers<[1], [1], [0], [0], [0, 0, 1, 0], [], []>} : vector<16x32xf32>, vector<64x32xf32>, vector<16x64xf32> -> vector<16x64xf32>
    %c0_12 = arith.constant 0 : index
    %c0_13 = arith.constant 0 : index
    %30 = vector.load %arg2[%c0_12, %c0_13] : memref<19x64xf32, #tpu.memory_space<vmem>>, vector<16x64xf32>
    %31 = arith.addf %29, %30 : vector<16x64xf32>
    %32 = math.exp %31 : vector<16x64xf32>
    %c128 = arith.constant 128 : index
    %c0_14 = arith.constant 0 : index
    %33 = vector.load %arg3[%c128, %c0_14] : memref<192x64xf32, #tpu.memory_space<vmem>>, vector<64x64xf32>
    %cst_15 = arith.constant dense<0.000000e+00> : vector<16x64xf32>
    %34 = tpu.matmul %32, %33, %cst_15 {dimension_numbers = #tpu.dot_dimension_numbers<[1], [0], [0], [1], [0, 0, 1, 1], [], []>} : vector<16x64xf32>, vector<64x64xf32>, vector<16x64xf32> -> vector<16x64xf32>
    %35 = tpu.reciprocal %34 {approx = true} : vector<16x64xf32> -> vector<16x64xf32>
    %36 = arith.mulf %34, %35 : vector<16x64xf32>
    %cst_16 = arith.constant 2.000000e+00 : f32
    %37 = vector.broadcast %cst_16 : f32 to vector<16x64xf32>
    %38 = arith.subf %37, %36 : vector<16x64xf32>
    %39 = arith.mulf %35, %38 : vector<16x64xf32>
    %40 = arith.mulf %32, %39 : vector<16x64xf32>
    %cst_17 = arith.constant dense<0.000000e+00> : vector<16x32xf32>
    %41 = tpu.matmul %40, %28, %cst_17 {dimension_numbers = #tpu.dot_dimension_numbers<[1], [0], [0], [1], [0, 0, 1, 1], [], []>} : vector<16x64xf32>, vector<64x32xf32>, vector<16x32xf32> -> vector<16x32xf32>
    %c0_18 = arith.constant 0 : index
    %c96 = arith.constant 96 : index
    %42 = vector.load %arg1[%c0_18, %c96] : memref<32x128xf32, #tpu.memory_space<vmem>>, vector<32x32xf32>
    %cst_19 = arith.constant dense<0.000000e+00> : vector<16x32xf32>
    %43 = tpu.matmul %41, %42, %cst_19 {dimension_numbers = #tpu.dot_dimension_numbers<[1], [0], [0], [1], [0, 0, 1, 1], [], []>} : vector<16x32xf32>, vector<32x32xf32>, vector<16x32xf32> -> vector<16x32xf32>
    %c18 = arith.constant 18 : index
    %c0_20 = arith.constant 0 : index
    %44 = vector.load %arg2[%c18, %c0_20] : memref<19x64xf32, #tpu.memory_space<vmem>>, vector<1x32xf32>
    %45 = vector.broadcast %44 : vector<1x32xf32> to vector<16x32xf32>
    %46 = arith.addf %43, %45 : vector<16x32xf32>
    %c0_21 = arith.constant 0 : index
    %c0_22 = arith.constant 0 : index
    %47 = vector.load %arg4[%c0_21, %c0_22] : memref<16x32xf32, #tpu.memory_space<vmem>>, vector<16x32xf32>
    tpu.vector_store %arg4[%c0_21, %c0_22], %46 {strides = array<i32>} : memref<16x32xf32, #tpu.memory_space<vmem>>, vector<16x32xf32>,
    return
  }
}

</mosaic_0001>

<bundles_post_ra>
// kernel: tpu_custom_call.1
= control target key start
LH: loop header
LB: loop body
LE: loop exit
PB: predicated region body
PF: predicated region fallthrough
CT: control target
= control target key end

     0   :  { %vm24_vm0 = vcmask 261120   ;;  %s1366_s0 = inlined_call_operand.vmem [shape: f32[16,32], index: 0, kind: input, shape index: {}]   ;;  %s1367_s1 = inlined_call_operand.vmem [shape: f32[32,128], index: 1, kind: input, shape index: {}]   ;;  %s1368_s2 = inlined_call_operand.vmem [shape: f32[19,64], index: 2, kind: input, shape index: {}]   ;;  %s1369_s3 = inlined_call_operand.vmem [shape: f32[192,64], index: 3, kind: input, shape index: {}]   ;;  %s1370_s4 = inlined_call_operand.hbm [shape: f32[16,32], index: 4, kind: output, shape index: {}]  }
   0x1   :  { %v1122_v0 = vld [vmem:[%s1367_s1 + $0x18] sm:$0xff]  ;;  %v1127_v1 = vld [vmem:[%s1367_s1 + $0x10] sm:$0xff]  ;;  %v18_v2 = vld [vmem:[%s1366_s0] sm:$0xff] }
   0x2   :  { %931 = vmatprep.subr.mxu0 %v1122_v0  ;;  %v1137_v3 = vld [vmem:[%s1367_s1 + $0x8] sm:$0xff]  ;;  %939 = vmatprep.mubr.msk.f32.mxu0 %vm24_vm0, %v18_v2  ;;  %v113_v4 = vld [vmem:[%s1369_s3 + $0x38] sm:$0xff]  ;;  %v112_v5 = vld [vmem:[%s1369_s3 + $0x30] sm:$0xff] }
   0x3   :  { %932 = vmatpush3.msra.mxu0 %v1122_v0  ;;  %942 = vmatprep.subr.mxu1 %v113_v4  ;;  %v1151_v6 = vld [vmem:[%s1367_s1] sm:$0xff]  ;;  %v111_v7 = vld [vmem:[%s1369_s3 + $0x28] sm:$0xff] }
   0x4   :  { %933 = vmatprep.subr.mxu0 %v1127_v1  ;;  %943 = vmatpush3.msra.mxu1 %v113_v4 }
   0x5   :  { %934 = vmatpush3.msra.mxu0 %v1127_v1 }
   0x6   :  { %9 = vsyncpa [#allocation3], 0  ;;  %935 = vmatprep.subr.mxu0 %v1137_v3  ;;  %944 = vmatprep.subr.mxu1 %v112_v5  ;;  %v19_v8 = vld [vmem:[%s1366_s0 + $0x8] sm:$0xff]  ;;  %v110_v9 = vld [vmem:[%s1369_s3 + $0x20] sm:$0xff]  ;;  %s1088_s19 = smov 32   ;;  %vm114_vm1 = vcmask 523264  }
   0x7   :  { %936 = vmatpush3.msra.mxu0 %v1137_v3  ;;  %945 = vmatpush3.msra.mxu1 %v112_v5  ;;  %v109_v10 = vld [vmem:[%s1369_s3 + $0x18] sm:$0xff]  ;;  %v108_v11 = vld [vmem:[%s1369_s3 + $0x10] sm:$0xff]  ;;  %v107_v12 = vld [vmem:[%s1369_s3 + $0x8] sm:$0xff]  ;;  %s1089_s9 = smov 96   ;;  %s1090_s0 = smov 64  }
   0x8   :  { %937 = vmatprep.subr.mxu0 %v1151_v6  ;;  %946 = vmatprep.subr.mxu1 %v111_v7  ;;  %v106_v13 = vld [vmem:[%s1369_s3] sm:$0xff]  ;;  %v1182_v14 = vld [vmem:[%s1369_s3 + $0x78] sm:$0xff]  ;;  %v1187_v15 = vld [vmem:[%s1369_s3 + $0x68] sm:$0xff]  ;;  %s1091_s5 = smov [#allocation2]  }
   0x9   :  { %938 = vmatpush3.msra.mxu0 %v1151_v6  ;;  %947 = vmatpush3.msra.mxu1 %v111_v7  ;;  %v1196_v16 = vld [vmem:[%s1369_s3 + $0x70] sm:$0xff]  ;;  %v1201_v17 = vld [vmem:[%s1369_s3 + $0x60] sm:$0xff]  ;;  %v1210_v18 = vld [vmem:[%s1369_s3 + $0x58] sm:$0xff]  ;;  %s833_s6 = sshll.u32 %s1091_s5, 4  ;;  %s834_s6 = int_to_ptr.vmem [resolvable:$true] %s833_s6 }
   0xa   :  { %940 = vmatmul.mubr.msk.f32.vlgmr.msra.gmra.mxu0 %vm24_vm0, %v19_v8  ;;  %961 = vmatprep.subr.mxu0 %v113_v4  ;;  %v1215_v19 = vld [vmem:[%s1369_s3 + $0x50] sm:$0xff]  ;;  %v1224_v20 = vld [vmem:[%s1369_s3 + $0x48] sm:$0xff]  ;;  %v1229_v21 = vld [vmem:[%s1369_s3 + $0x40] sm:$0xff]  ;;  %s1066_s1 = scalar_lea.vmem %s834_s6, 256  ;;  %p1071_p1 = scmp.lt.s32.totalorder %s834_s6, %s834_s6 }
   0xb   :  { %962 = vmatpush3.msra.mxu0 %v113_v4  ;;  %948 = vmatprep.subr.mxu1 %v110_v9  ;;  %v850_v39 = vld [vmem:[%s1368_s2 + $0x10] ss:$0 sm:$0xff]  ;;  %v851_v44 = vld [vmem:[%s1368_s2 + $0x11] ss:$0 sm:$0xff]  ;;  %v519_v2 = vld [vmem:[%s1369_s3 + $0xb8] sm:$0xff]  ;;  %p1067_p0 = scmp.ne.s32.totalorder %s834_s6, %s1066_s1  ;;  %p1072_p2 = scmp.lt.s32.totalorder %s1066_s1, %s1066_s1 }
   0xc   :  { %963 = vmatprep.subr.mxu0 %v112_v5  ;;  %949 = vmatpush3.msra.mxu1 %v110_v9  ;;  %v518_v4 = vld [vmem:[%s1369_s3 + $0xb0] sm:$0xff]  ;;  %v515_v8 = vld [vmem:[%s1369_s3 + $0x98] sm:$0xff] }
   0xd   :  { %964 = vmatpush3.msra.mxu0 %v112_v5  ;;  %950 = vmatprep.subr.mxu1 %v109_v10  ;;  %v517_v5 = vld [vmem:[%s1369_s3 + $0xa8] sm:$0xff]  ;;  %p1073_p3 = por %p1072_p2, %p1071_p1 }
   0xe   :  { %965 = vmatprep.subr.mxu0 %v111_v7  ;;  %951 = vmatpush3.msra.mxu1 %v109_v10 }
   0xf   :  { %966 = vmatpush3.msra.mxu0 %v111_v7  ;;  %952 = vmatprep.subr.mxu1 %v108_v11  ;;  %v516_v7 = vld [vmem:[%s1369_s3 + $0xa0] sm:$0xff]  ;;  %p1074_p4 = pnand %p1073_p3, %p1067_p0 }
  0x10   :  { %967 = vmatprep.subr.mxu0 %v110_v9  ;;  %953 = vmatpush3.msra.mxu1 %v108_v11 }
  0x11   :  { %968 = vmatpush3.msra.mxu0 %v110_v9  ;;  %954 = vmatprep.subr.mxu1 %v107_v12  ;;  %v514_v9 = vld [vmem:[%s1369_s3 + $0x90] sm:$0xff] }
  0x12   :  { %969 = vmatprep.subr.mxu0 %v109_v10  ;;  %955 = vmatpush3.msra.mxu1 %v107_v12 }
  0x13   :  { %970 = vmatpush3.msra.mxu0 %v109_v10  ;;  %956 = vmatprep.subr.mxu1 %v106_v13  ;;  %v513_v10 = vld [vmem:[%s1369_s3 + $0x88] sm:$0xff] }
  0x14   :  { %971 = vmatprep.subr.mxu0 %v108_v11  ;;  %957 = vmatpush3.msra.mxu1 %v106_v13 }
  0x15   :  { %972 = vmatpush3.msra.mxu0 %v108_v11  ;;  %335 = vrot.lane.b32.xlu0 %v1182_v14, %s1088_s19  ;;  %v512_v11 = vld [vmem:[%s1369_s3 + $0x80] sm:$0xff] }
  0x16   :  { %973 = vmatprep.subr.mxu0 %v107_v12  ;;  %331 = vrot.lane.b32.xlu1 %v1187_v15, %s1088_s19 }
  0x17   :  { %974 = vmatpush3.msra.mxu0 %v107_v12 }
  0x18   :  { %975 = vmatprep.subr.mxu0 %v106_v13 }
  0x19   :  { %976 = vmatpush3.msra.mxu0 %v106_v13  ;;  %333 = vrot.lane.b32.xlu0 %v1196_v16, %s1088_s19 }
  0x1a   :  { %329 = vrot.lane.b32.xlu1 %v1201_v17, %s1088_s19  ;;  %999 = vmatprep.subr.mxu0 %v519_v2 }
  0x1d   :  { %327 = vrot.lane.b32.xlu0 %v1210_v18, %s1088_s19 }
  0x1e   :  { %325 = vrot.lane.b32.xlu1 %v1215_v19, %s1088_s19 }
  0x21   :  { %323 = vrot.lane.b32.xlu0 %v1224_v20, %s1088_s19 }
  0x22   :  { %321 = vrot.lane.b32.xlu1 %v1229_v21, %s1088_s19 }
  0x87   :  { %v336_v36 = vpop.permute.xlu0 %335 }
  0x88   :  { %v332_v40 = vpop.permute.xlu1 %331 }
  0x8b   :  { %v334_v47 = vpop.permute.xlu0 %333 }
  0x8c   :  { %v330_v50 = vpop.permute.xlu1 %329 }
  0x8f   :  { %v328_v54 = vpop.permute.xlu0 %327 }
  0x90   :  { %v326_v56 = vpop.permute.xlu1 %325 }
  0x93   :  { %v324_v59 = vpop.permute.xlu0 %323 }
  0x94   :  { %v322_v61 = vpop.permute.xlu1 %321 }
  0xca   :  { %v1235_v22 = vpop.f32.mrf.mxu0 }
  0xcb   :  { %v197_v25 = vmul.f32 %v1235_v22, %v1235_v22 }
  0xcc   :  { %v1237_v23 = vpop.f32.mrf.mxu0 }
  0xcd   :  { %958 = vmatprep.mubr.msk.f32.mxu1 %vm114_vm1, %v1237_v23  ;;  %v196_v24 = vmul.f32 %v1237_v23, %v1237_v23 }
  0xce   :  { %959 = vmatmul.mubr.msk.f32.vlgmr.msra.gmra.mxu1 %vm114_vm1, %v1235_v22 }
  0xcf   :  { %977 = vmatprep.mubr.msk.f32.mxu0 %vm114_vm1, %v196_v24 }
  0xd0   :  { %978 = vmatmul.mubr.msk.f32.vlgmr.msra.gmra.mxu0 %vm114_vm1, %v197_v25 }
  0xd1   :  { %1000 = vmatpush3.msra.mxu0 %v519_v2 }
  0xd2   :  { %1001 = vmatprep.subr.mxu0 %v518_v4 }
  0xd3   :  { %1002 = vmatpush3.msra.mxu0 %v518_v4 }
  0xd4   :  { %1003 = vmatprep.subr.mxu0 %v517_v5 }
  0xd5   :  { %1004 = vmatpush3.msra.mxu0 %v517_v5 }
  0xd6   :  { %1005 = vmatprep.subr.mxu0 %v516_v7 }
  0xd7   :  { %1006 = vmatpush3.msra.mxu0 %v516_v7 }
  0xd8   :  { %1007 = vmatprep.subr.mxu0 %v515_v8 }
  0xd9   :  { %1008 = vmatpush3.msra.mxu0 %v515_v8  ;;  %v866_v8 = vld [vmem:[%s1368_s2 + $0x12] ss:$0 sm:$0xff] }
  0xda   :  { %1009 = vmatprep.subr.mxu0 %v514_v9 }
  0xdb   :  { %1010 = vmatpush3.msra.mxu0 %v514_v9 }
  0xdc   :  { %1011 = vmatprep.subr.mxu0 %v513_v10 }
  0xdd   :  { %1012 = vmatpush3.msra.mxu0 %v513_v10 }
  0xde   :  { %1013 = vmatprep.subr.mxu0 %v512_v11 }
  0xdf   :  { %1014 = vmatpush3.msra.mxu0 %v512_v11 }
 0x18e   :  { %v960_v26 = vpop.f32.mrf.mxu1 }
 0x18f   :  { %v280_v27 = vmul.f32 %v960_v26, %v960_v26  ;;  %v286_v37 = vsub.f32 %v1235_v22, %v960_v26 }
 0x190   :  { %v187_v28 = vpop.f32.mrf.mxu1  ;;  %v979_v29 = vpop.f32.mrf.mxu0 }
 0x191   :  { %v279_v30 = vmul.f32 %v187_v28, %v187_v28  ;;  %v282_v31 = vsub.f32 %v979_v29, %v280_v27  ;;  %v285_v41 = vsub.f32 %v1237_v23, %v187_v28 }
 0x192   :  { %v270_v32 = vpop.f32.mrf.mxu0 }
 0x193   :  { %v288_v33 = vadd.f32 1e-05, %v282_v31  ;;  %v281_v34 = vsub.f32 %v270_v32, %v279_v30 }
 0x195   :  { %1054 = vrsqrt.f32 %v288_v33  ;;  %v287_v35 = vadd.f32 1e-05, %v281_v34 }
 0x197   :  { %1056 = vrsqrt.f32 %v287_v35 }
 0x1a2   :  { %v1055_v38 = vpop.eup %1054 }
 0x1a3   :  { %v292_v42 = vmul.f32 %v1055_v38, %v286_v37 }
 0x1a4   :  { %v1057_v43 = vpop.eup %1056 }
 0x1a5   :  { %v291_v45 = vmul.f32 %v1057_v43, %v285_v41  ;;  %v298_v46 = vmul.f32 %v850_v39, %v292_v42 }
 0x1a7   :  { %v1257_v48 = vadd.f32 %v851_v44, %v298_v46  ;;  %v297_v49 = vmul.f32 %v850_v39, %v291_v45 }
 0x1a9   :  { %v352_v51 = vmul.f32 %v336_v36, %v1257_v48  ;;  %v303_v52 = vadd.f32 %v851_v44, %v297_v49  ;;  %v350_v55 = vmul.f32 %v332_v40, %v1257_v48  ;;  %v348_v58 = vmul.f32 %v328_v54, %v1257_v48 }
 0x1aa   :  { %v346_v62 = vmul.f32 %v324_v59, %v1257_v48 }
 0x1ab   :  { %v351_v53 = vmul.f32 %v334_v47, %v303_v52  ;;  %409 = vrot.lane.b32.xlu0 %v352_v51, %s1089_s9  ;;  %996 = vmatprep.mubr.msk.f32.mxu1 %vm24_vm0, %v303_v52  ;;  %v349_v57 = vmul.f32 %v330_v50, %v303_v52  ;;  %v347_v60 = vmul.f32 %v326_v56, %v303_v52 }
 0x1ac   :  { %v345_v63 = vmul.f32 %v322_v61, %v303_v52 }
 0x1ad   :  { %407 = vrot.lane.b32.xlu1 %v351_v53, %s1089_s9 }
 0x1af   :  { %405 = vrot.lane.b32.xlu0 %v350_v55, %s1089_s9 }
 0x1b1   :  { %403 = vrot.lane.b32.xlu1 %v349_v57, %s1089_s9 }
 0x1b3   :  { %401 = vrot.lane.b32.xlu0 %v348_v58, %s1089_s9 }
 0x1b5   :  { %399 = vrot.lane.b32.xlu1 %v347_v60, %s1089_s9 }
 0x1b7   :  { %397 = vrot.lane.b32.xlu0 %v346_v62, %s1089_s9 }
 0x1b9   :  { %395 = vrot.lane.b32.xlu1 %v345_v63, %s1089_s9 }
 0x1bb   :  { %367 = vrot.lane.b32.xlu0 %v1182_v14, %s1090_s0 }
 0x1bd   :  { %365 = vrot.lane.b32.xlu1 %v1196_v16, %s1090_s0 }
 0x1bf   :  { %363 = vrot.lane.b32.xlu0 %v1187_v15, %s1090_s0 }
 0x1c1   :  { %361 = vrot.lane.b32.xlu1 %v1201_v17, %s1090_s0 }
 0x1c3   :  { %359 = vrot.lane.b32.xlu0 %v1210_v18, %s1090_s0 }
 0x1c5   :  { %357 = vrot.lane.b32.xlu1 %v1215_v19, %s1090_s0 }
 0x1c7   :  { %355 = vrot.lane.b32.xlu0 %v1224_v20, %s1090_s0 }
 0x1c9   :  { %353 = vrot.lane.b32.xlu1 %v1229_v21, %s1090_s0 }
 0x21d   :  { %v410_v12 = vpop.permute.xlu0 %409 }
 0x21e   :  { %980 = vmatprep.subr.msk.mxu1 %vm24_vm0, %v410_v12 }
 0x21f   :  { %981 = vmatpush3.xpose.msk.msra.mxu1 %vm24_vm0, %v410_v12  ;;  %v408_v13 = vpop.permute.xlu1 %407 }
 0x220   :  { %982 = vmatprep.subr.msk.mxu1 %vm24_vm0, %v408_v13 }
 0x221   :  { %v406_v14 = vpop.permute.xlu0 %405 }
 0x223   :  { %983 = vmatpush3.xpose.msk.msra.mxu1 %vm24_vm0, %v408_v13  ;;  %v404_v15 = vpop.permute.xlu1 %403 }
 0x224   :  { %984 = vmatprep.subr.msk.mxu1 %vm24_vm0, %v406_v14 }
 0x225   :  { %v402_v16 = vpop.permute.xlu0 %401 }
 0x227   :  { %985 = vmatpush3.xpose.msk.msra.mxu1 %vm24_vm0, %v406_v14  ;;  %v400_v17 = vpop.permute.xlu1 %399 }
 0x228   :  { %986 = vmatprep.subr.msk.mxu1 %vm24_vm0, %v404_v15 }
 0x229   :  { %v398_v18 = vpop.permute.xlu0 %397 }
 0x22b   :  { %987 = vmatpush3.xpose.msk.msra.mxu1 %vm24_vm0, %v404_v15  ;;  %v396_v19 = vpop.permute.xlu1 %395 }
 0x22c   :  { %988 = vmatprep.subr.msk.mxu1 %vm24_vm0, %v402_v16 }
 0x22d   :  { %v368_v20 = vpop.permute.xlu0 %367 }
 0x22e   :  { %v384_v21 = vmul.f32 %v1235_v22, %v368_v20 }
 0x22f   :  { %989 = vmatpush3.xpose.msk.msra.mxu1 %vm24_vm0, %v402_v16  ;;  %v366_v24 = vpop.permute.xlu1 %365 }
 0x230   :  { %v383_v25 = vmul.f32 %v366_v24, %v1237_v23  ;;  %633 = vrot.lane.b32.xlu0 %v384_v21, %s1090_s0  ;;  %990 = vmatprep.subr.msk.mxu1 %vm24_vm0, %v400_v17 }
 0x231   :  { %v364_v26 = vpop.permute.xlu0 %363 }
 0x232   :  { %v382_v27 = vmul.f32 %v1235_v22, %v364_v26  ;;  %631 = vrot.lane.b32.xlu1 %v383_v25, %s1090_s0 }
 0x233   :  { %991 = vmatpush3.xpose.msk.msra.mxu1 %vm24_vm0, %v400_v17  ;;  %v362_v28 = vpop.permute.xlu1 %361 }
 0x234   :  { %v381_v29 = vmul.f32 %v362_v28, %v1237_v23  ;;  %629 = vrot.lane.b32.xlu0 %v382_v27, %s1090_s0  ;;  %992 = vmatprep.subr.msk.mxu1 %vm24_vm0, %v398_v18 }
 0x235   :  { %v360_v30 = vpop.permute.xlu0 %359 }
 0x236   :  { %v380_v31 = vmul.f32 %v1235_v22, %v360_v30  ;;  %627 = vrot.lane.b32.xlu1 %v381_v29, %s1090_s0 }
 0x237   :  { %993 = vmatpush3.xpose.msk.msra.mxu1 %vm24_vm0, %v398_v18  ;;  %v358_v32 = vpop.permute.xlu1 %357 }
 0x238   :  { %v379_v33 = vmul.f32 %v358_v32, %v1237_v23  ;;  %625 = vrot.lane.b32.xlu0 %v380_v31, %s1090_s0  ;;  %994 = vmatprep.subr.msk.mxu1 %vm24_vm0, %v396_v19 }
 0x239   :  { %v356_v34 = vpop.permute.xlu0 %355 }
 0x23a   :  { %v378_v35 = vmul.f32 %v1235_v22, %v356_v34  ;;  %623 = vrot.lane.b32.xlu1 %v379_v33, %s1090_s0 }
 0x23b   :  { %995 = vmatpush3.xpose.msk.msra.mxu1 %vm24_vm0, %v396_v19  ;;  %v354_v36 = vpop.permute.xlu1 %353 }
 0x23c   :  { %v377_v37 = vmul.f32 %v354_v36, %v1237_v23  ;;  %621 = vrot.lane.b32.xlu0 %v378_v35, %s1090_s0  ;;  %v386_v23 = vld [vmem:[%s1368_s2 + $0x8] sm:$0xff] }
 0x23e   :  { %997 = vmatmul.mubr.msk.f32.vlgmr.msra.gmra.mxu1 %vm24_vm0, %v1257_v48  ;;  %619 = vrot.lane.b32.xlu1 %v377_v37, %s1090_s0 }
 0x240   :  { %739 = vrot.lane.b32.xlu0 %v1122_v0, %s1088_s19  ;;  %v385_v0 = vld [vmem:[%s1368_s2] sm:$0xff] }
 0x242   :  { %737 = vrot.lane.b32.xlu1 %v1127_v1, %s1088_s19 }
 0x244   :  { %735 = vrot.lane.b32.xlu0 %v1137_v3, %s1088_s19 }
 0x246   :  { %733 = vrot.lane.b32.xlu1 %v1151_v6, %s1088_s19 }
 0x2a2   :  { %v634_v22 = vpop.permute.xlu0 %633 }
 0x2a3   :  { %1018 = vmatprep.subr.mxu0 %v634_v22 }
 0x2a4   :  { %v632_v3 = vpop.permute.xlu1 %631 }
 0x2a6   :  { %v630_v44 = vpop.permute.xlu0 %629 }
 0x2a8   :  { %v628_v45 = vpop.permute.xlu1 %627 }
 0x2aa   :  { %v626_v46 = vpop.permute.xlu0 %625 }
 0x2ac   :  { %v624_v47 = vpop.permute.xlu1 %623 }
 0x2ae   :  { %v622_v48 = vpop.permute.xlu0 %621 }
 0x2b0   :  { %v620_v49 = vpop.permute.xlu1 %619 }
 0x2b2   :  { %v740_v50 = vpop.permute.xlu0 %739 }
 0x2b3   :  { %1037 = vmatprep.subr.mxu1 %v740_v50 }
 0x2b4   :  { %v738_v51 = vpop.permute.xlu1 %737  ;;  %1038 = vmatpush3.msra.mxu1 %v740_v50 }
 0x2b5   :  { %1039 = vmatprep.subr.mxu1 %v738_v51 }
 0x2b6   :  { %v736_v52 = vpop.permute.xlu0 %735  ;;  %1040 = vmatpush3.msra.mxu1 %v738_v51 }
 0x2b7   :  { %1041 = vmatprep.subr.mxu1 %v736_v52 }
 0x2b8   :  { %1042 = vmatpush3.msra.mxu1 %v736_v52  ;;  %v734_v4 = vpop.permute.xlu1 %733 }
 0x2b9   :  { %1043 = vmatprep.subr.mxu1 %v734_v4 }
 0x2ba   :  { %1044 = vmatpush3.msra.mxu1 %v734_v4 }
 0x2fe   :  { %v998_v38 = vpop.f32.mrf.mxu1 }
 0x2ff   :  { %v505_v39 = vadd.f32 %v998_v38, %v386_v23 }
 0x300   :  { %v499_v40 = vpop.f32.mrf.mxu1 }
 0x301   :  { %v500_v1 = vadd.f32 %v499_v40, %v385_v0  ;;  %v510_v41 = vmul.f32 1.442695, %v505_v39 }
 0x303   :  { %v508_v42 = vmul.f32 1.442695, %v500_v1 }
 0x305   :  { %1058 = vpow2.f32 %v508_v42 }
 0x306   :  { %1060 = vpow2.f32 %v510_v41 }
 0x312   :  { %v1059_v6 = vpop.eup %1058 }
 0x313   :  { %v1061_v43 = vpop.eup %1060  ;;  %1015 = vmatprep.mubr.msk.f32.mxu0 %vm114_vm1, %v1059_v6 }
 0x314   :  { %1016 = vmatmul.mubr.msk.f32.vlgmr.msra.gmra.mxu0 %vm114_vm1, %v1061_v43 }
 0x315   :  { %1019 = vmatpush3.msra.mxu0 %v634_v22 }
 0x316   :  { %1020 = vmatprep.subr.mxu0 %v632_v3 }
 0x317   :  { %1021 = vmatpush3.msra.mxu0 %v632_v3 }
 0x318   :  { %1022 = vmatprep.subr.mxu0 %v630_v44 }
 0x319   :  { %1023 = vmatpush3.msra.mxu0 %v630_v44 }
 0x31a   :  { %1024 = vmatprep.subr.mxu0 %v628_v45 }
 0x31b   :  { %1025 = vmatpush3.msra.mxu0 %v628_v45 }
 0x31c   :  { %1026 = vmatprep.subr.mxu0 %v626_v46 }
 0x31d   :  { %1027 = vmatpush3.msra.mxu0 %v626_v46 }
 0x31e   :  { %1028 = vmatprep.subr.mxu0 %v624_v47 }
 0x31f   :  { %1029 = vmatpush3.msra.mxu0 %v624_v47 }
 0x320   :  { %1030 = vmatprep.subr.mxu0 %v622_v48 }
 0x321   :  { %1031 = vmatpush3.msra.mxu0 %v622_v48 }
 0x322   :  { %1032 = vmatprep.subr.mxu0 %v620_v49 }
 0x323   :  { %1033 = vmatpush3.msra.mxu0 %v620_v49 }
 0x3d4   :  { %v1017_v53 = vpop.f32.mrf.mxu0 }
 0x3d5   :  { %1062 = vrcp.f32 %v1017_v53 }
 0x3d6   :  { %v592_v54 = vpop.f32.mrf.mxu0 }
 0x3d7   :  { %1064 = vrcp.f32 %v592_v54 }
 0x3e2   :  { %v1063_v55 = vpop.eup %1062 }
 0x3e3   :  { %v604_v56 = vmul.f32 %v1063_v55, %v1017_v53 }
 0x3e4   :  { %v1065_v57 = vpop.eup %1064 }
 0x3e5   :  { %v606_v58 = vsub.f32 2.0, %v604_v56  ;;  %v603_v59 = vmul.f32 %v1065_v57, %v592_v54 }
 0x3e7   :  { %v605_v60 = vsub.f32 2.0, %v603_v59  ;;  %v608_v61 = vmul.f32 %v1063_v55, %v606_v58 }
 0x3e9   :  { %v607_v62 = vmul.f32 %v1065_v57, %v605_v60  ;;  %v610_v2 = vmul.f32 %v1061_v43, %v608_v61 }
 0x3eb   :  { %v609_v63 = vmul.f32 %v1059_v6, %v607_v62 }
 0x3ed   :  { %1034 = vmatprep.mubr.msk.f32.mxu0 %vm114_vm1, %v609_v63 }
 0x3ee   :  { %1035 = vmatmul.mubr.msk.f32.vlgmr.msra.gmra.mxu0 %vm114_vm1, %v610_v2 }
 0x4ae   :  { %v1036_v5 = vpop.f32.mrf.mxu0 }
 0x4b0   :  { %v715_v7 = vpop.f32.mrf.mxu0 }
 0x4b1   :  { %1045 = vmatprep.mubr.msk.f32.mxu1 %vm24_vm0, %v715_v7 }
 0x4b2   :  { %1046 = vmatmul.mubr.msk.f32.vlgmr.msra.gmra.mxu1 %vm24_vm0, %v1036_v5 }
 0x572   :  { %v1047_v9 = vpop.f32.mrf.mxu1 }
 0x573   :  { %v823_v10 = vadd.f32 %v1047_v9, %v866_v8 }
 0x574   :  { %v817_v11 = vpop.f32.mrf.mxu1 }
 0x575   :  { %827 = vst.msk [vmem:[#allocation2 + $0x8] sm:$0xff] %vm24_vm0, %v823_v10  ;;  %v818_v12 = vadd.f32 %v866_v8, %v817_v11 }
 0x577   :  { %826 = vst.msk [vmem:[#allocation2] sm:$0xff] %vm24_vm0, %v818_v12 }
 0x578   :  { %1077 = shalt.err (!%p1074_p4)
}
 0x579   :  { %s1092_s7 = smov 128   ;;  %s1093_s2 = smov 8  }
 0x57a   :  { %839 = dma.vmem_to_hbm [thread:$0]  %s834_s6, 256, %s1370_s4, [#allocation3], %s1092_s7, %s1092_s7, %s1093_s2  }
 0x57b   :  { %1086 = dma.done.wait [#allocation3], 256  }
 0x57c   :  { %1087 = vsyncadd [#allocation3], 4294967040 }
 0x57d   :  { %843 = vsyncpa [#allocation3], 1 }

</bundles_post_ra>
